<compile_context>
chip_gen: v5e
topology: v5e:2x2
jax: 0.10.0
libtpu: 0.0.40
codegen_flags: <defaults>
</compile_context>

<pallas_src>
import jax
import jax.numpy as jnp
from jax.experimental import pallas as pl
from jax.experimental.pallas import tpu as pltpu


def _shortcut_kernel(x_ref, w_ref, shift_ref, o_ref):
    # x_ref:     (TH, Wo, Cin)        input already fully stride-subsampled, or
    #            (TH, Wo, S, Cin)     with the W stride-phase axis still present
    # w_ref:     (Cin, TN)            1x1 conv weight with BN scale folded in
    # shift_ref: (1, TN)              BN shift = beta - mean * scale   (f32)
    # o_ref:     (TH, Wo, TN)         NHWC output tile (Cout on the lane axis)
    th, wo, tn = o_ref.shape
    cin = x_ref.shape[-1]

    if len(x_ref.shape) == 4:
        x = x_ref[:, :, 0, :]            # static phase-0 select (no strided ds)
    else:
        x = x_ref[...]

    acc = jnp.dot(x.reshape(th * wo, cin), w_ref[...],
                  preferred_element_type=jnp.float32)        # (TH*Wo, TN) f32
    acc = acc + shift_ref[...]                               # f32 BN epilogue
    o_ref[...] = acc.reshape(th, wo, tn).astype(o_ref.dtype)


def _vmem_capacity_bytes():
    try:
        info = pltpu.get_tpu_info()
        for attr in ("vmem_capacity_bytes", "vmem_size_bytes", "vmem_bytes"):
            cap = getattr(info, attr, None)
            if cap:
                return int(cap)
    except Exception:
        pass
    return 64 * 1024 * 1024      # conservative: v7x has 64 MiB per TensorCore


def _pick_tiles(n, ho, wo, cin, cout, w_fetch_per_row, x_item, o_item, w_item,
                vmem_cap):
    """Choose (TH, TN, n_cout_blocks) from the per-generation VMEM capacity."""
    # Cout tile: keep the folded weight fully resident whenever it fits.
    weight_budget = 8 << 20
    if cin * cout * w_item <= weight_budget:
        tn = cout                                    # weight DMAed exactly once
    else:
        tn = min(cout,
                 max(128, ((weight_budget // (cin * w_item)) // 128) * 128))
    n_co = pl.cdiv(cout, tn)

    # H tile: as large as the (double-buffered) VMEM budget allows.
    w_tile_bytes = cin * tn * w_item
    usable = max(8 << 20, min(int(vmem_cap * 0.78), vmem_cap - (12 << 20)))
    x_row = w_fetch_per_row * cin * x_item           # fetched bytes / output row
    o_row = wo * tn * o_item
    per_pipe = max(2 * (x_row + o_row), usable - 2 * w_tile_bytes - (1 << 20))
    th_cap = per_pipe // (2 * (x_row + o_row))
    # Soft per-block cap so v5e/v6e (128 MiB VMEM) don't build absurd blocks.
    th_cap = min(th_cap, max(1, (24 << 20) // x_row), max(1, (24 << 20) // o_row))
    # v7x has 2 TensorCores: keep at least 2 grid steps so neither idles.
    if n * n_co < 2 and ho >= 2:
        th_cap = min(th_cap, max(1, ho // 2))
    th_cap = int(max(1, min(th_cap, ho)))
    th = 1
    for cand in range(1, th_cap + 1):                # largest divisor of Ho
        if ho % cand == 0:
            th = cand
    return th, tn, n_co


def rtdetr_resnet_shortcut_nhwc(x_nhwc, conv_weight, gamma, beta,
                                running_mean, running_var, *, stride=2,
                                eps=1e-5, compute_dtype=None,
                                w_subsample_in_blockspec=None):
    """Fused 1x1 conv(stride) + BatchNorm (inference).  NHWC in, NHWC out."""
    n, h, w_in, cin = x_nhwc.shape
    cout = conv_weight.shape[0]
    assert conv_weight.shape[1] == cin and conv_weight.shape[2:] == (1, 1)

    if compute_dtype is not None and x_nhwc.dtype != compute_dtype:
        # bf16 I/O halves HBM traffic; cast once upstream, not inside the kernel.
        x_nhwc = x_nhwc.astype(compute_dtype)
    dtype = x_nhwc.dtype
    x_item = jnp.dtype(dtype).itemsize
    o_item = x_item

    ho = -(-h // stride)        # ceil: 1x1 conv, stride s, no padding
    wo = -(-w_in // stride)
    pad_h = stride * ho - h
    pad_w = stride * wo - w_in
    if pad_h or pad_w:
        # Padded rows/cols land on discarded stride phases -> never read.
        x_nhwc = jnp.pad(x_nhwc, ((0, 0), (0, pad_h), (0, pad_w), (0, 0)))

    # Fold BatchNorm (inference) into the conv weight + a per-channel f32 shift.
    scale = (gamma.astype(jnp.float32)
             / jnp.sqrt(running_var.astype(jnp.float32) + eps))
    shift = beta.astype(jnp.float32) - running_mean.astype(jnp.float32) * scale
    w2d = (conv_weight.reshape(cout, cin).astype(jnp.float32) * scale[:, None]).T
    w2d = w2d.astype(dtype)                 # bf16 operands hit the bf16 MXU peak
    shift2d = shift.reshape(1, cout)        # epilogue stays in f32
    w_item = jnp.dtype(w2d.dtype).itemsize

    # W-phase subsample in the BlockSpec only when the resulting per-chunk DMA
    # (Cin contiguous elements) stays efficient; otherwise fetch both W phases
    # contiguously and select phase 0 in-kernel with a static index.
    if w_subsample_in_blockspec is None:
        w_subsample_in_blockspec = (stride == 1) or (cin * x_item >= 512)
    w_fetch_per_row = wo if w_subsample_in_blockspec else wo * stride

    vmem_cap = _vmem_capacity_bytes()
    th, tn, n_co = _pick_tiles(n, ho, wo, cin, cout, w_fetch_per_row,
                               x_item, o_item, w_item, vmem_cap)
    grid = (n, ho // th, n_co)

    # Free dim-split reshape: both stride phases become explicit axes so the
    # subsample is expressed by the BlockSpec, not by strided in-kernel reads.
    x6 = x_nhwc.reshape(n, ho, stride, wo, stride, cin)
    if w_subsample_in_blockspec:
        x_spec = pl.BlockSpec(
            (pl.Squeezed(), th, pl.Squeezed(), wo, pl.Squeezed(), cin),
            lambda b, i, j: (b, i, 0, 0, 0, 0))
    else:
        x_spec = pl.BlockSpec(
            (pl.Squeezed(), th, pl.Squeezed(), wo, stride, cin),
            lambda b, i, j: (b, i, 0, 0, 0, 0))
    w_spec = pl.BlockSpec((cin, tn), lambda b, i, j: (0, j))
    s_spec = pl.BlockSpec((1, tn), lambda b, i, j: (0, j))
    o_spec = pl.BlockSpec((pl.Squeezed(), th, wo, tn),
                          lambda b, i, j: (b, i, 0, j))

    # Explicit VMEM budget: double-buffered x/o blocks + (once-fetched) weight.
    x_blk = th * w_fetch_per_row * cin * x_item
    o_blk = th * wo * tn * o_item
    w_blk = cin * tn * w_item
    need = 2 * (x_blk + o_blk) + 2 * w_blk + tn * 4 + (6 << 20)
    cap = (52 << 20) if vmem_cap <= (80 << 20) else (100 << 20)
    vmem_limit = int(max(32 << 20, min(cap, need, vmem_cap - (4 << 20))))

    m_total = n * ho * wo
    cost = pl.CostEstimate(
        flops=2 * m_total * cin * cout,
        transcendentals=0,
        bytes_accessed=(n * ho * w_fetch_per_row * cin * x_item  # real input fetch
                        + cin * cout * w_item                    # weight read once
                        + m_total * cout * o_item))              # output written once

    return pl.pallas_call(
        _shortcut_kernel,
        out_shape=jax.ShapeDtypeStruct((n, ho, wo, cout), dtype),
        grid_spec=pltpu.PrefetchScalarGridSpec(
            num_scalar_prefetch=0,
            grid=grid,
            in_specs=[x_spec, w_spec, s_spec],
            out_specs=o_spec),
        compiler_params=pltpu.CompilerParams(
            dimension_semantics=("parallel", "parallel", "parallel"),
            vmem_limit_bytes=vmem_limit),
        cost_estimate=cost,
    )(x6, w2d, shift2d)


def rtdetr_resnet_shortcut(x_nchw, conv_weight, gamma, beta, running_mean,
                           running_var, *, stride=2, eps=1e-5,
                           compute_dtype=None, w_subsample_in_blockspec=None):
    """PyTorch-layout (NCHW) compatibility wrapper.

    The layout conversion lives only at this boundary; inside a full network the
    NHWC entry point should be chained directly so no transpose passes hit HBM
    (keeping Cout lane-dense on stores is the big out-spec lever)."""
    x_nhwc = jnp.transpose(x_nchw, (0, 2, 3, 1))
    out_nhwc = rtdetr_resnet_shortcut_nhwc(
        x_nhwc, conv_weight, gamma, beta, running_mean, running_var,
        stride=stride, eps=eps, compute_dtype=compute_dtype,
        w_subsample_in_blockspec=w_subsample_in_blockspec)
    return jnp.transpose(out_nhwc, (0, 3, 1, 2))


def _reference(x_nchw, conv_weight, gamma, beta, running_mean, running_var,
               *, stride=2, eps=1e-5):
    x_sub = x_nchw[:, :, ::stride, ::stride]
    w2 = conv_weight.reshape(conv_weight.shape[0], conv_weight.shape[1])
    conv = jnp.einsum("nchw,oc->nohw", x_sub, w2,
                      precision=jax.lax.Precision.HIGHEST)
    scale = gamma / jnp.sqrt(running_var + eps)
    shift = beta - running_mean * scale
    return conv * scale[None, :, None, None] + shift[None, :, None, None]


if __name__ == "__main__":
    key = jax.random.PRNGKey(0)
    k_x, k_w, k_g, k_b, k_m, k_v = jax.random.split(key, 6)

    N, CIN, COUT, H, W, STRIDE = 2, 32, 64, 16, 16, 2

    x = jax.random.normal(k_x, (N, CIN, H, W), dtype=jnp.float32)
    conv_weight = jax.random.normal(k_w, (COUT, CIN, 1, 1),
                                    dtype=jnp.float32) * 0.1
    gamma = 1.0 + 0.1 * jax.random.normal(k_g, (COUT,), dtype=jnp.float32)
    beta = 0.1 * jax.random.normal(k_b, (COUT,), dtype=jnp.float32)
    running_mean = 0.1 * jax.random.normal(k_m, (COUT,), dtype=jnp.float32)
    running_var = jnp.abs(
        1.0 + 0.1 * jax.random.normal(k_v, (COUT,), dtype=jnp.float32))

    ref2 = _reference(x, conv_weight, gamma, beta, running_mean, running_var,
                      stride=2)
    ref1 = _reference(x, conv_weight, gamma, beta, running_mean, running_var,
                      stride=1)

    # 1) stride=2 downsampling shortcut, small-Cin path (H subsample in the
    #    BlockSpec, static W phase-0 select in-kernel).
    out2 = rtdetr_resnet_shortcut(x, conv_weight, gamma, beta, running_mean,
                                  running_var, stride=STRIDE)
    jax.block_until_ready(out2)
    assert out2.shape == (N, COUT, H // STRIDE, W // STRIDE)
    assert jnp.allclose(out2, ref2, atol=2e-2, rtol=2e-2), \
        float(jnp.max(jnp.abs(out2 - ref2)))

    # 2) stride=2, both H and W subsamples expressed in the BlockSpec
    #    (the large-Cin path, forced here to exercise it at a small shape).
    out2b = rtdetr_resnet_shortcut(x, conv_weight, gamma, beta, running_mean,
                                   running_var, stride=STRIDE,
                                   w_subsample_in_blockspec=True)
    jax.block_until_ready(out2b)
    assert jnp.allclose(out2b, ref2, atol=2e-2, rtol=2e-2), \
        float(jnp.max(jnp.abs(out2b - ref2)))

    # 3) stride=1 projection shortcut (used after the AvgPool shortcut variant).
    out1 = rtdetr_resnet_shortcut(x, conv_weight, gamma, beta, running_mean,
                                  running_var, stride=1)
    jax.block_until_ready(out1)
    assert out1.shape == (N, COUT, H, W)
    assert jnp.allclose(out1, ref1, atol=2e-2, rtol=2e-2), \
        float(jnp.max(jnp.abs(out1 - ref1)))

    # 4) bf16 activation I/O path (f32 accumulate + f32 BN shift), loose tol.
    out_bf = rtdetr_resnet_shortcut(x, conv_weight, gamma, beta, running_mean,
                                    running_var, stride=STRIDE,
                                    compute_dtype=jnp.bfloat16)
    jax.block_until_ready(out_bf)
    assert out_bf.dtype == jnp.bfloat16
    err = jnp.max(jnp.abs(out_bf.astype(jnp.float32) - ref2))
    assert jnp.allclose(out_bf.astype(jnp.float32), ref2, atol=8e-2, rtol=8e-2), \
        float(err)

    print("KERNEL_OK")
</pallas_src>

<mosaic_0001>
module attributes {stable_mosaic.version = 11 : i64} {
  func.func @_shortcut_kernel(%arg0: i32, %arg1: i32, %arg2: i32, %arg3: memref<1x8x1x8x2x32xf32, #tpu.memory_space<vmem>>, %arg4: memref<32x64xf32, #tpu.memory_space<vmem>>, %arg5: memref<1x64xf32, #tpu.memory_space<vmem>>, %arg6: memref<1x8x8x64xf32, #tpu.memory_space<vmem>>) attributes {dimension_semantics = [#tpu.dimension_semantics<parallel>, #tpu.dimension_semantics<parallel>, #tpu.dimension_semantics<parallel>], iteration_bounds = array<i64: 2, 1, 1>, scalar_prefetch = 0 : i64, scratch_operands = 0 : i64, tpu.core_type = #tpu.core_type<tc>, window_params = [{transform_indices = @transform_0, window_bounds = array<i64: 1, 8, 1, 8, 2, 32>}, {transform_indices = @transform_1, window_bounds = array<i64: 32, 64>}, {transform_indices = @transform_2, window_bounds = array<i64: 1, 64>}, {transform_indices = @transform_3, window_bounds = array<i64: 1, 8, 8, 64>}]} {
    %c0 = arith.constant 0 : index
    %c0_0 = arith.constant 0 : index
    %c0_1 = arith.constant 0 : index
    %c0_2 = arith.constant 0 : index
    %c0_3 = arith.constant 0 : index
    %c0_4 = arith.constant 0 : index
    %0 = vector.load %arg3[%c0, %c0_0, %c0_1, %c0_2, %c0_3, %c0_4] : memref<1x8x1x8x2x32xf32, #tpu.memory_space<vmem>>, vector<1x8x1x8x1x32xf32>
    %1 = vector.shape_cast %0 : vector<1x8x1x8x1x32xf32> to vector<8x8x32xf32>
    %2 = vector.shape_cast %1 : vector<8x8x32xf32> to vector<64x32xf32>
    %c0_5 = arith.constant 0 : index
    %c0_6 = arith.constant 0 : index
    %3 = vector.load %arg4[%c0_5, %c0_6] : memref<32x64xf32, #tpu.memory_space<vmem>>, vector<32x64xf32>
    %cst = arith.constant dense<0.000000e+00> : vector<64x64xf32>
    %4 = tpu.matmul %2, %3, %cst {dimension_numbers = #tpu.dot_dimension_numbers<[1], [0], [0], [1], [0, 0, 1, 1], [], []>} : vector<64x32xf32>, vector<32x64xf32>, vector<64x64xf32> -> vector<64x64xf32>
    %c0_7 = arith.constant 0 : index
    %c0_8 = arith.constant 0 : index
    %5 = vector.load %arg5[%c0_7, %c0_8] : memref<1x64xf32, #tpu.memory_space<vmem>>, vector<1x64xf32>
    %6 = vector.broadcast %5 : vector<1x64xf32> to vector<64x64xf32>
    %7 = arith.addf %4, %6 : vector<64x64xf32>
    %8 = vector.shape_cast %7 : vector<64x64xf32> to vector<8x8x64xf32>
    %c0_9 = arith.constant 0 : index
    %c0_10 = arith.constant 0 : index
    %c0_11 = arith.constant 0 : index
    %c0_12 = arith.constant 0 : index
    %9 = vector.load %arg6[%c0_9, %c0_10, %c0_11, %c0_12] : memref<1x8x8x64xf32, #tpu.memory_space<vmem>>, vector<1x8x8x64xf32>
    %10 = vector.shape_cast %9 : vector<1x8x8x64xf32> to vector<8x8x64xf32>
    %11 = vector.shape_cast %8 : vector<8x8x64xf32> to vector<1x8x8x64xf32>
    tpu.vector_store %arg6[%c0_9, %c0_10, %c0_11, %c0_12], %11 {strides = array<i32>} : memref<1x8x8x64xf32, #tpu.memory_space<vmem>>, vector<1x8x8x64xf32>,
    return
  }
  func.func @transform_0(%arg0: i32, %arg1: i32, %arg2: i32) -> (i32, i32, i32, i32, i32, i32) {
    %c0_i32 = arith.constant 0 : i32
    %c0_i32_0 = arith.constant 0 : i32
    %c0_i32_1 = arith.constant 0 : i32
    %c0_i32_2 = arith.constant 0 : i32
    %c0_i32_3 = arith.constant 0 : i32
    return %arg0, %arg1, %c0_i32, %c0_i32_0, %c0_i32_1, %c0_i32_2 : i32, i32, i32, i32, i32, i32
  }
  func.func @transform_1(%arg0: i32, %arg1: i32, %arg2: i32) -> (i32, i32) {
    %c0_i32 = arith.constant 0 : i32
    %c0_i32_0 = arith.constant 0 : i32
    return %c0_i32, %arg2 : i32, i32
  }
  func.func @transform_2(%arg0: i32, %arg1: i32, %arg2: i32) -> (i32, i32) {
    %c0_i32 = arith.constant 0 : i32
    %c0_i32_0 = arith.constant 0 : i32
    return %c0_i32, %arg2 : i32, i32
  }
  func.func @transform_3(%arg0: i32, %arg1: i32, %arg2: i32) -> (i32, i32, i32, i32) {
    %c0_i32 = arith.constant 0 : i32
    %c0_i32_0 = arith.constant 0 : i32
    return %arg0, %arg1, %c0_i32, %arg2 : i32, i32, i32, i32
  }
}

</mosaic_0001>

<bundles_post_ra>
// kernel: tpu_custom_call.1
= control target key start
LH: loop header
LB: loop body
LE: loop exit
PB: predicated region body
PF: predicated region fallthrough
CT: control target
= control target key end

     0   :  { %8 = vsyncpa [#allocation3], 0  ;;  %s1317_s0 = inlined_call_operand.hbm [shape: f32[2,8,2,8,2,32], index: 0, kind: input, shape index: {}]   ;;  %s1318_s1 = inlined_call_operand.hbm [shape: f32[32,64], index: 1, kind: input, shape index: {}]   ;;  %s1319_s2 = inlined_call_operand.vmem [shape: f32[1,64], index: 2, kind: input, shape index: {}]   ;;  %s1320_s3 = inlined_call_operand.hbm [shape: f32[2,8,8,64], index: 3, kind: output, shape index: {}]  }
   0x1   :  { %10 = vsyncpa [#allocation3 + $0x1], 0 }
   0x2   :  { %11 = vsyncpa [#allocation6], 0 }
   0x3   :  { %12 = vsyncpa [#allocation4], 0 }
   0x4   :  { %14 = vsyncpa [#allocation4 + $0x1], 0  ;;  %s1017_s12 = smov 0   ;;  %s1019_s13 = smov 0  }
   0x5   :  { %s1021_s14 = smov 0   ;;  %s1023_s15 = smov 0  }
   0x6   :  { %s1025_s16 = smov 0   ;;  %s1027_s17 = smov 0  }
   0x7 LB: > { %s740_s18 = sadd.s32 4294967295, %s984_s17   ;;  %s741_s19 = sadd.s32 4294967294, %s984_s17   ;;  %s984_s17 = sphi %s1027_s17, %s20_s17   ;;  %s980_s16 = sphi %s1025_s16, %s1331_s16   ;;  %s976_s15 = sphi %s1023_s15, %s1330_s15   ;;  %s972_s14 = sphi %s1021_s14, %s1329_s14   ;;  %s968_s13 = sphi %s1019_s13, %s1328_s13   ;;  %s964_s12 = sphi %s1017_s12, %s1327_s12  }
   0x8   : > { %s39_s20 = sadd.s32 1, %s980_s16  ;;  %s48_s21 = sadd.s32 1, %s972_s14 }
   0x9   : > { %p41_p0 = scmp.ge.s32.totalorder %s39_s20, 2  ;;  %p55_p1 = scmp.ne.s32.totalorder %s972_s14, %s968_s13 }
   0xa   : > { %p56_p2 = scmp.eq.s32.totalorder %s984_s17, 0  ;;  %p61_p3 = scmp.ne.s32.totalorder %s968_s13, %s964_s12 }
   0xb   : > { %s1333_s20 = smov (%p41_p0, %s39_s20), 0  ;;  %p1062_p5 = scmp.eq.s32.totalorder %s740_s18, 0 }
   0xc   : > { %p1058_p4 = por %p56_p2, %p55_p1  ;;  %s43_s24 = ssub.s32 %s980_s16, %s1333_s20 }
   0xd   : > { %p141_p6 = scmp.eq.s32.totalorder %s740_s18, 1  ;;  %p46_p7 = scmp.eq.s32.totalorder %s43_s24, 0 }
   0xe   : > { %p1070_p8 = por %p1062_p5, %p61_p3  ;;  %p147_p10 = scmp.eq.s32.totalorder %s741_s19, 1 }
   0xf   : > { %p1074_p9 = por %p141_p6, %p55_p1  ;;  %p742_p12 = scmp.ge.s32.totalorder %s984_s17, 1 }
  0x10   : > { %s1079_s27 = scalar_select %p46_p7, %s972_s14, %s48_s21  }
  0x11   : > { %p1081_p11 = por %p147_p10, %p61_p3  ;;  %p154_p13 = scmp.lt.s32.totalorder %s984_s17, 3 }
  0x12   : > { %s167_s4 = sshll.u32 %s1318_s1, 4  ;;  %s986_s6 = smov [#allocation5]   ;;  %s168_s4 = int_to_ptr.hbm [resolvable:$true] %s167_s4 }
  0x13   : > { %p1090_p0 = pnand %p742_p12, %p154_p13  ;;  %s169_s7 = sshll.u32 %s986_s6, 4  ;;  %s170_s7 = int_to_ptr.vmem [resolvable:$true] %s169_s7 }
  0x14   : > { %s987_s8 = smov 128   ;;  %s988_s9 = smov 8  }
  0x15   : > { %p797_p1 = pneg %p1090_p0  ;;  %p745_p3 = scmp.ge.s32.totalorder %s984_s17, 2 }
  0x17   : > { %p798_p2 = pnand %p797_p1, %p1062_p5  ;;  %185 = sbr.rel (%p745_p3) target bundleno = 42 (0x2a), region = 24 }
  0x19   : > { %800 = dma.hbm_to_vmem [thread:$0]  (!%p798_p2), %s168_s4, 512, %s170_s7, [#allocation6], %s987_s8, %s987_s8, %s988_s9  }
  0x1c   : > { %s189_s10 = sand.u32 1, %s972_s14   ;;  %s768_s11 = sshll.u32 %s980_s16, 8 }
  0x1d   : > { %s746_s18 = sshll.u32 %s189_s10, 7  ;;  %s201_s24 = scalar_lea.hbm %s1317_s0, %s768_s11 }
  0x1e   : > { %s784_s29 = scalar_select %p1058_p4, [#allocation0], [#allocation10] }
  0x1f   : > { %s214_s30 = sshll.u32 %s201_s24, 4  ;;  %s193_s4 = scalar_lea.vmem [#allocation2], %s746_s18  ;;  %s215_s30 = int_to_ptr.hbm [resolvable:$true] %s214_s30 }
  0x20   : > { %s216_s6 = sshll.u32 %s193_s4, 4  ;;  %s206_s7 = sld [smem:[%s784_s29]]   ;;  %s217_s6 = int_to_ptr.vmem [resolvable:$true] %s216_s6 }
  0x21   : > { %s989_s8 = smov 512   ;;  %s990_s9 = smov 256  }
  0x22   : > { %785 = sst [smem:[#allocation9]] (%p1058_p4), %s989_s8  ;;  %s991_s19 = smov 8  }
  0x23   : > { %786 = sst [smem:[#allocation9 + $0x1]] (%p1058_p4), %s990_s9  ;;  %s992_s11 = smov 32  }
  0x24   : > { %787 = sst [smem:[#allocation9 + $0x2]] (%p1058_p4), %s991_s19  ;;  %s993_s24 = smov 2  }
  0x25   : > { %788 = sst [smem:[#allocation9 + $0x3]] (%p1058_p4), %s992_s11  ;;  %s190_s29 = scalar_lea.sflag [#allocation3], %s189_s10 }
  0x26   : > { %s749_s21 = sshll.u32 %s206_s7, 26  ;;  %789 = sst [smem:[#allocation9 + $0x4]] (%p1058_p4), %s992_s11 }
  0x27   : > { %s750_s18 = sadd.s32 134217728, %s749_s21  ;;  %790 = sst [smem:[#allocation9 + $0x5]] (%p1058_p4), %s993_s24 }
  0x28   : > { %s994_s4 = smov [#allocation8]  }
  0x29   : > { %791 = dma.general (%p1058_p4), %s215_s30, 2048, %s217_s6, %s190_s29, %s994_s4, [#allocation9], %s750_s18, 0  }
  0x2a PF: > { %241 = sbr.rel (%p1090_p0) target bundleno = 224 (0xe0), region = 32  ;;  %s1125_s8 = sand.u32 (!%p1090_p0), 1, %s968_s13  }
  0x2b   : > { %s752_s7 = sshll.u32 (!%p1090_p0), %s1125_s8, 7  ;;  %s244_s9 = scalar_lea.sflag (!%p1090_p0), [#allocation3], %s1125_s8 }
  0x2c   : > { %s1129_s19 = scalar_lea.vmem (!%p1090_p0), [#allocation2], %s752_s7 }
  0x2f   : > { %951 = dma.done.wait (%p1070_p8), %s244_s9, 2048  }
  0x30   : > { %953 = vsyncadd (%p1070_p8), %s244_s9, 4294965248 }
  0x31   : > { %955 = dma.done.wait (%p1062_p5), [#allocation6], 512  }
  0x32   : > { %957 = vsyncadd (%p1062_p5), [#allocation6], 4294966784  ;;  %vm421_vm0 = vcmask 1041409   ;;  %vm424_vm1 = vcmask 1042434   ;;  %v351_v0 = vld [vmem:[#allocation5 + $0x18] sm:$0xff]  ;;  %v350_v1 = vld [vmem:[#allocation5 + $0x10] sm:$0xff] }
  0x33   : > { %vm427_vm2 = vcmask 1043459   ;;  %vm430_vm3 = vcmask 1044484   ;;  %vm433_vm4 = vcmask 1045509   ;;  %vm436_vm5 = vcmask 1046534   ;;  %771 = vmatpush.msra.mxu2 %v351_v0  ;;  %772 = vmatpush.msra.mxu3 %v351_v0  ;;  %v349_v2 = vld [vmem:[#allocation5 + $0x8] sm:$0xff]  ;;  %v348_v11 = vld [vmem:[#allocation5] sm:$0xff] }
  0x34   : > { %v316_v3 = vld [vmem:[%s1129_s19 + $0x40] sm:$0x1]  ;;  %v317_v4 = vld [vmem:[%s1129_s19 + $0x42] sm:$0x1]  ;;  %vm439_vm6 = vcmask 1047559   ;;  %568 = vmatpush.msra.mxu0 %v351_v0  ;;  %770 = vmatpush.msra.mxu1 %v351_v0  ;;  %vm539_vm7 = vcmask 261120  }
  0x35   : > { %v318_v5 = vld [vmem:[%s1129_s19 + $0x44] sm:$0x1]  ;;  %v319_v6 = vld [vmem:[%s1129_s19 + $0x46] sm:$0x1]  ;;  %v320_v7 = vld [vmem:[%s1129_s19 + $0x48] sm:$0x1]  ;;  %774 = vmatpush.msra.mxu2 %v350_v1  ;;  %775 = vmatpush.msra.mxu3 %v350_v1 }
  0x36   : > { %v321_v8 = vld [vmem:[%s1129_s19 + $0x4a] sm:$0x1]  ;;  %v322_v9 = vld [vmem:[%s1129_s19 + $0x4c] sm:$0x1]  ;;  %v323_v10 = vld [vmem:[%s1129_s19 + $0x4e] sm:$0x1]  ;;  %569 = vmatpush.msra.mxu0 %v350_v1  ;;  %773 = vmatpush.msra.mxu1 %v350_v1 }
  0x37   : > { %v483_v12 = vrot.slane %v317_v4, 7  ;;  %v485_v13 = vrot.slane %v318_v5, 6  ;;  %v487_v14 = vrot.slane %v319_v6, 5  ;;  %777 = vmatpush.msra.mxu2 %v349_v2  ;;  %778 = vmatpush.msra.mxu3 %v349_v2  ;;  %v489_v15 = vrot.slane %v320_v7, 4  ;;  %v332_v19 = vld [vmem:[%s1129_s19 + $0x60] sm:$0x1] }
  0x38   : > { %v491_v16 = vrot.slane %v321_v8, 3  ;;  %v493_v17 = vrot.slane %v322_v9, 2  ;;  %v495_v18 = vrot.slane %v323_v10, 1  ;;  %v333_v20 = vld [vmem:[%s1129_s19 + $0x62] sm:$0x1]  ;;  %570 = vmatpush.msra.mxu0 %v349_v2  ;;  %776 = vmatpush.msra.mxu1 %v349_v2  ;;  %s754_s22 = sshll.u32 %s1125_s8, 6 }
  0x39   : > { %v484_v21 = vsel %vm421_vm0, %v483_v12, %v316_v3  ;;  %v334_v22 = vld [vmem:[%s1129_s19 + $0x64] sm:$0x1]  ;;  %v335_v23 = vld [vmem:[%s1129_s19 + $0x66] sm:$0x1]  ;;  %v336_v24 = vld [vmem:[%s1129_s19 + $0x68] sm:$0x1]  ;;  %780 = vmatpush.msra.mxu2 %v348_v11  ;;  %781 = vmatpush.msra.mxu3 %v348_v11 }
  0x3a   : > { %v486_v25 = vsel %vm424_vm1, %v485_v13, %v484_v21  ;;  %v337_v26 = vld [vmem:[%s1129_s19 + $0x6a] sm:$0x1]  ;;  %v338_v27 = vld [vmem:[%s1129_s19 + $0x6c] sm:$0x1]  ;;  %v339_v28 = vld [vmem:[%s1129_s19 + $0x6e] sm:$0x1]  ;;  %571 = vmatpush.msra.mxu0 %v348_v11  ;;  %779 = vmatpush.msra.mxu1 %v348_v11 }
  0x3b   : > { %v488_v29 = vsel %vm427_vm2, %v487_v14, %v486_v25  ;;  %v511_v30 = vrot.slane %v333_v20, 7  ;;  %v513_v31 = vrot.slane %v334_v22, 6  ;;  %v515_v32 = vrot.slane %v335_v23, 5  ;;  %v284_v33 = vld [vmem:[%s1129_s19] sm:$0x1]  ;;  %s278_s5 = scalar_lea.vmem [#allocation7], %s754_s22 }
  0x3c   : > { %v490_v34 = vsel %vm430_vm3, %v489_v15, %v488_v29  ;;  %v517_v35 = vrot.slane %v336_v24, 4  ;;  %v519_v36 = vrot.slane %v337_v26, 3  ;;  %v521_v37 = vrot.slane %v338_v27, 2  ;;  %v285_v38 = vld [vmem:[%s1129_s19 + $0x2] sm:$0x1]  ;;  %s769_s10 = sshll.u32 %s976_s15, 6 }
  0x3d   : > { %v492_v39 = vsel %vm433_vm4, %v491_v16, %v490_v34  ;;  %v512_v40 = vsel %vm421_vm0, %v511_v30, %v332_v19  ;;  %v523_v41 = vrot.slane %v339_v28, 1  ;;  %v286_v42 = vld [vmem:[%s1129_s19 + $0x4] sm:$0x1]  ;;  %v287_v43 = vld [vmem:[%s1129_s19 + $0x6] sm:$0x1]  ;;  %v420_v44 = vrot.slane %v285_v38, 7  ;;  %s621_s11 = scalar_lea.hbm %s1320_s3, %s769_s10 }
  0x3e   : > { %v494_v45 = vsel %vm436_vm5, %v493_v17, %v492_v39  ;;  %v514_v46 = vsel %vm424_vm1, %v513_v31, %v512_v40  ;;  %v288_v47 = vld [vmem:[%s1129_s19 + $0x8] sm:$0x1]  ;;  %v289_v48 = vld [vmem:[%s1129_s19 + $0xa] sm:$0x1]  ;;  %v290_v49 = vld [vmem:[%s1129_s19 + $0xc] sm:$0x1] }
  0x3f   : > { %v496_v50 = vsel %vm439_vm6, %v495_v18, %v494_v45  ;;  %v516_v51 = vsel %vm427_vm2, %v515_v32, %v514_v46  ;;  %v291_v52 = vld [vmem:[%s1129_s19 + $0xe] sm:$0x1]  ;;  %v422_v53 = vsel %vm421_vm0, %v420_v44, %v284_v33  ;;  %v423_v54 = vrot.slane %v286_v42, 6  ;;  %v300_v59 = vld [vmem:[%s1129_s19 + $0x20] sm:$0x1]  ;;  %s622_s21 = sshll.u32 %s278_s5, 4  ;;  %s623_s21 = int_to_ptr.vmem [resolvable:$true] %s622_s21 }
  0x40   : > { %759 = vmatmul.msk.f32.vlgmr.msra.gmra.mxu2 %vm539_vm7, %v496_v50  ;;  %v518_v55 = vsel %vm430_vm3, %v517_v35, %v516_v51  ;;  %v426_v56 = vrot.slane %v287_v43, 5  ;;  %v429_v57 = vrot.slane %v288_v47, 4  ;;  %v432_v58 = vrot.slane %v289_v48, 3  ;;  %v301_v60 = vld [vmem:[%s1129_s19 + $0x22] sm:$0x1]  ;;  %s624_s18 = sshll.u32 %s621_s11, 4  ;;  %s625_s18 = int_to_ptr.hbm [resolvable:$true] %s624_s18 }
  0x41   : > { %v520_v61 = vsel %vm433_vm4, %v519_v36, %v518_v55  ;;  %v425_v62 = vsel %vm424_vm1, %v423_v54, %v422_v53  ;;  %v435_v63 = vrot.slane %v290_v49, 2  ;;  %v438_v0 = vrot.slane %v291_v52, 1  ;;  %v302_v1 = vld [vmem:[%s1129_s19 + $0x24] sm:$0x1]  ;;  %v303_v2 = vld [vmem:[%s1129_s19 + $0x26] sm:$0x1] }
  0x42   : > { %v522_v3 = vsel %vm436_vm5, %v521_v37, %v520_v61  ;;  %v428_v4 = vsel %vm427_vm2, %v426_v56, %v425_v62  ;;  %v304_v5 = vld [vmem:[%s1129_s19 + $0x28] sm:$0x1]  ;;  %v305_v6 = vld [vmem:[%s1129_s19 + $0x2a] sm:$0x1]  ;;  %v306_v7 = vld [vmem:[%s1129_s19 + $0x2c] sm:$0x1] }
  0x43   : > { %v524_v8 = vsel %vm439_vm6, %v523_v41, %v522_v3  ;;  %v431_v9 = vsel %vm430_vm3, %v429_v57, %v428_v4  ;;  %v307_v10 = vld [vmem:[%s1129_s19 + $0x2e] sm:$0x1]  ;;  %v455_v11 = vrot.slane %v301_v60, 7  ;;  %v457_v12 = vrot.slane %v302_v1, 6  ;;  %v324_v17 = vld [vmem:[%s1129_s19 + $0x50] sm:$0x1] }
  0x44   : > { %761 = vmatmul.msk.f32.vlgmr.msra.gmra.mxu3 %vm539_vm7, %v524_v8  ;;  %v434_v13 = vsel %vm433_vm4, %v432_v58, %v431_v9  ;;  %v459_v14 = vrot.slane %v303_v2, 5  ;;  %v461_v15 = vrot.slane %v304_v5, 4  ;;  %v463_v16 = vrot.slane %v305_v6, 3  ;;  %v325_v18 = vld [vmem:[%s1129_s19 + $0x52] sm:$0x1]  ;;  %s607_s15 = scalar_lea.sflag [#allocation4], %s1125_s8 }
  0x45   : > { %v437_v19 = vsel %vm436_vm5, %v435_v63, %v434_v13  ;;  %v456_v20 = vsel %vm421_vm0, %v455_v11, %v300_v59  ;;  %v465_v21 = vrot.slane %v306_v7, 2  ;;  %v467_v22 = vrot.slane %v307_v10, 1  ;;  %v326_v23 = vld [vmem:[%s1129_s19 + $0x54] sm:$0x1]  ;;  %v327_v24 = vld [vmem:[%s1129_s19 + $0x56] sm:$0x1] }
  0x46   : > { %v440_v25 = vsel %vm439_vm6, %v438_v0, %v437_v19  ;;  %v458_v26 = vsel %vm424_vm1, %v457_v12, %v456_v20  ;;  %v328_v27 = vld [vmem:[%s1129_s19 + $0x58] sm:$0x1]  ;;  %v329_v28 = vld [vmem:[%s1129_s19 + $0x5a] sm:$0x1]  ;;  %v330_v29 = vld [vmem:[%s1129_s19 + $0x5c] sm:$0x1] }
  0x47   : > { %755 = vmatmul.msk.f32.vlgmr.msra.gmra.mxu0 %vm539_vm7, %v440_v25  ;;  %v460_v30 = vsel %vm427_vm2, %v459_v14, %v458_v26  ;;  %v331_v31 = vld [vmem:[%s1129_s19 + $0x5e] sm:$0x1]  ;;  %v497_v32 = vrot.slane %v325_v18, 7  ;;  %v499_v33 = vrot.slane %v326_v23, 6  ;;  %v501_v34 = vrot.slane %v327_v24, 5  ;;  %s912_s24 = sshra.s32 %s625_s18, 4  ;;  %s913_s24 = int_to_ptr.hbm [resolvable:$true] %s912_s24 }
  0x48   : > { %v462_v35 = vsel %vm430_vm3, %v461_v15, %v460_v30  ;;  %v503_v36 = vrot.slane %v328_v27, 4  ;;  %v505_v37 = vrot.slane %v329_v28, 3  ;;  %v340_v38 = vld [vmem:[%s1129_s19 + $0x70] sm:$0x1]  ;;  %v507_v41 = vrot.slane %v330_v29, 2  ;;  %s914_s29 = scalar_lea.hbm %s913_s24, 64  ;;  %p919_p7 = scmp.lt.s32.totalorder %s913_s24, %s1320_s3 }
  0x49   : > { %v464_v39 = vsel %vm433_vm4, %v463_v16, %v462_v35  ;;  %v498_v40 = vsel %vm421_vm0, %v497_v32, %v324_v17  ;;  %v509_v42 = vrot.slane %v331_v31, 1  ;;  %v341_v43 = vld [vmem:[%s1129_s19 + $0x72] sm:$0x1]  ;;  %v342_v44 = vld [vmem:[%s1129_s19 + $0x74] sm:$0x1]  ;;  %vm597_vm8 = vcmask 523264   ;;  %p915_p4 = scmp.ne.s32.totalorder %s913_s24, %s914_s29 }
  0x4a   : > { %v466_v45 = vsel %vm436_vm5, %v465_v21, %v464_v39  ;;  %v500_v46 = vsel %vm424_vm1, %v499_v33, %v498_v40  ;;  %v343_v47 = vld [vmem:[%s1129_s19 + $0x76] sm:$0x1]  ;;  %v344_v48 = vld [vmem:[%s1129_s19 + $0x78] sm:$0x1]  ;;  %v345_v49 = vld [vmem:[%s1129_s19 + $0x7a] sm:$0x1] }
  0x4b   : > { %v468_v50 = vsel %vm439_vm6, %v467_v22, %v466_v45  ;;  %v502_v51 = vsel %vm427_vm2, %v501_v34, %v500_v46  ;;  %v346_v52 = vld [vmem:[%s1129_s19 + $0x7c] sm:$0x1]  ;;  %v347_v53 = vld [vmem:[%s1129_s19 + $0x7e] sm:$0x1]  ;;  %v525_v54 = vrot.slane %v341_v43, 7  ;;  %v527_v55 = vrot.slane %v342_v44, 6  ;;  %p916_p5 = pnand %p915_p4, %p1074_p9 }
  0x4c   : > { %757 = vmatmul.msk.f32.vlgmr.msra.gmra.mxu1 %vm539_vm7, %v468_v50  ;;  %v504_v56 = vsel %vm430_vm3, %v503_v36, %v502_v51  ;;  %v529_v57 = vrot.slane %v343_v47, 5  ;;  %v531_v58 = vrot.slane %v344_v48, 4  ;;  %v533_v59 = vrot.slane %v345_v49, 3  ;;  %v292_v60 = vld [vmem:[%s1129_s19 + $0x10] sm:$0x1]  ;;  %s918_s9 = scalar_lea.hbm %s1320_s3, 128 }
  0x4d   : > { %v506_v61 = vsel %vm433_vm4, %v505_v37, %v504_v56  ;;  %v526_v62 = vsel %vm421_vm0, %v525_v54, %v340_v38  ;;  %v535_v63 = vrot.slane %v346_v52, 2  ;;  %v537_v0 = vrot.slane %v347_v53, 1  ;;  %v293_v1 = vld [vmem:[%s1129_s19 + $0x12] sm:$0x1]  ;;  %v294_v2 = vld [vmem:[%s1129_s19 + $0x14] sm:$0x1]  ;;  %p917_p6 = pneg %p916_p5  ;;  %p920_p8 = scmp.lt.s32.totalorder %s918_s9, %s914_s29 }
  0x4e   : > { %v508_v3 = vsel %vm436_vm5, %v507_v41, %v506_v61  ;;  %v528_v4 = vsel %vm424_vm1, %v527_v55, %v526_v62  ;;  %v295_v5 = vld [vmem:[%s1129_s19 + $0x16] sm:$0x1]  ;;  %v296_v6 = vld [vmem:[%s1129_s19 + $0x18] sm:$0x1]  ;;  %v297_v7 = vld [vmem:[%s1129_s19 + $0x1a] sm:$0x1] }
  0x4f   : > { %v510_v8 = vsel %vm439_vm6, %v509_v42, %v508_v3  ;;  %v530_v9 = vsel %vm427_vm2, %v529_v57, %v528_v4  ;;  %v298_v10 = vld [vmem:[%s1129_s19 + $0x1c] sm:$0x1]  ;;  %v299_v11 = vld [vmem:[%s1129_s19 + $0x1e] sm:$0x1]  ;;  %v441_v12 = vrot.slane %v293_v1, 7  ;;  %v443_v13 = vrot.slane %v294_v2, 6  ;;  %p921_p10 = por %p920_p8, %p919_p7 }
  0x50   : > { %760 = vmatmul.msk.f32.gmra.mxu2 %vm539_vm7, %v510_v8  ;;  %v532_v14 = vsel %vm430_vm3, %v531_v58, %v530_v9  ;;  %v445_v15 = vrot.slane %v295_v5, 5  ;;  %v447_v16 = vrot.slane %v296_v6, 4  ;;  %v449_v17 = vrot.slane %v297_v7, 3  ;;  %v308_v18 = vld [vmem:[%s1129_s19 + $0x30] sm:$0x1] }
  0x51   : > { %v534_v19 = vsel %vm433_vm4, %v533_v59, %v532_v14  ;;  %v442_v20 = vsel %vm421_vm0, %v441_v12, %v292_v60  ;;  %v451_v21 = vrot.slane %v298_v10, 2  ;;  %v453_v22 = vrot.slane %v299_v11, 1  ;;  %v309_v23 = vld [vmem:[%s1129_s19 + $0x32] sm:$0x1]  ;;  %v310_v24 = vld [vmem:[%s1129_s19 + $0x34] sm:$0x1]  ;;  %p922_p12 = pnand %p921_p10, %p917_p6 }
  0x52   : > { %v536_v25 = vsel %vm436_vm5, %v535_v63, %v534_v19  ;;  %v444_v26 = vsel %vm424_vm1, %v443_v13, %v442_v20  ;;  %v311_v27 = vld [vmem:[%s1129_s19 + $0x36] sm:$0x1]  ;;  %v312_v28 = vld [vmem:[%s1129_s19 + $0x38] sm:$0x1]  ;;  %v313_v29 = vld [vmem:[%s1129_s19 + $0x3a] sm:$0x1] }
  0x53   : > { %v538_v30 = vsel %vm439_vm6, %v537_v0, %v536_v25  ;;  %v446_v31 = vsel %vm427_vm2, %v445_v15, %v444_v26  ;;  %v314_v32 = vld [vmem:[%s1129_s19 + $0x3c] sm:$0x1]  ;;  %v469_v33 = vrot.slane %v309_v23, 7  ;;  %v471_v34 = vrot.slane %v310_v24, 6  ;;  %v315_v36 = vld [vmem:[%s1129_s19 + $0x3e] sm:$0x1] }
  0x54   : > { %762 = vmatmul.msk.f32.gmra.mxu3 %vm539_vm7, %v538_v30  ;;  %v448_v35 = vsel %vm430_vm3, %v447_v16, %v446_v31  ;;  %v473_v37 = vrot.slane %v311_v27, 5  ;;  %v475_v38 = vrot.slane %v312_v28, 4  ;;  %v477_v41 = vrot.slane %v313_v29, 3  ;;  %v867_v52 = vld [vmem:[%s1319_s2] ss:$0 sm:$0xff] }
  0x55   : > { %v450_v39 = vsel %vm433_vm4, %v449_v17, %v448_v35  ;;  %v470_v40 = vsel %vm421_vm0, %v469_v33, %v308_v18  ;;  %v479_v44 = vrot.slane %v314_v32, 2  ;;  %v481_v47 = vrot.slane %v315_v36, 1 }
  0x56   : > { %v452_v42 = vsel %vm436_vm5, %v451_v21, %v450_v39  ;;  %v472_v43 = vsel %vm424_vm1, %v471_v34, %v470_v40 }
  0x57   : > { %v454_v45 = vsel %vm439_vm6, %v453_v22, %v452_v42  ;;  %v474_v46 = vsel %vm427_vm2, %v473_v37, %v472_v43 }
  0x58   : > { %756 = vmatmul.msk.f32.gmra.mxu0 %vm539_vm7, %v454_v45  ;;  %v476_v48 = vsel %vm430_vm3, %v475_v38, %v474_v46 }
  0x59   : > { %v478_v49 = vsel %vm433_vm4, %v477_v41, %v476_v48 }
  0x5a   : > { %v480_v50 = vsel %vm436_vm5, %v479_v44, %v478_v49 }
  0x5b   : > { %v482_v51 = vsel %vm439_vm6, %v481_v47, %v480_v50 }
  0x5c   : > { %758 = vmatmul.msk.f32.gmra.mxu1 %vm539_vm7, %v482_v51 }
  0xc3   : > { %v585_v53 = vpop.f32.mrf.mxu2 }
  0xc4   : > { %v573_v54 = vpop.f32.mrf.mxu0  ;;  %v586_v55 = vadd.f32 %v867_v52, %v585_v53 }
  0xc5   : > { %v574_v56 = vadd.f32 %v867_v52, %v573_v54 }
  0xc6   : > { %602 = vst.msk [vmem:[%s278_s5 + $0x20] sm:$0xff] %vm597_vm8, %v586_v55 }
  0xc7   : > { %598 = vst.msk [vmem:[%s278_s5] sm:$0xff] %vm597_vm8, %v574_v56  ;;  %v591_v57 = vpop.f32.mrf.mxu3 }
  0xc8   : > { %v592_v58 = vadd.f32 %v867_v52, %v591_v57 }
  0xc9   : > { %v579_v59 = vpop.f32.mrf.mxu1 }
  0xca   : > { %v580_v60 = vadd.f32 %v867_v52, %v579_v59  ;;  %604 = vst.msk [vmem:[%s278_s5 + $0x30] sm:$0xff] %vm597_vm8, %v592_v58 }
  0xcc   : > { %600 = vst.msk [vmem:[%s278_s5 + $0x10] sm:$0xff] %vm597_vm8, %v580_v60 }
  0xd3   : > { %v588_v61 = vpop.f32.mrf.mxu2 }
  0xd4   : > { %v589_v62 = vadd.f32 %v867_v52, %v588_v61 }
  0xd5   : > { %v576_v63 = vpop.f32.mrf.mxu0 }
  0xd6   : > { %v577_v0 = vadd.f32 %v867_v52, %v576_v63  ;;  %603 = vst.msk [vmem:[%s278_s5 + $0x28] sm:$0xff] %vm597_vm8, %v589_v62 }
  0xd7   : > { %v594_v1 = vpop.f32.mrf.mxu3 }
  0xd8   : > { %599 = vst.msk [vmem:[%s278_s5 + $0x8] sm:$0xff] %vm597_vm8, %v577_v0  ;;  %v595_v2 = vadd.f32 %v867_v52, %v594_v1 }
  0xd9   : > { %v582_v3 = vpop.f32.mrf.mxu1 }
  0xda   : > { %v583_v4 = vadd.f32 %v867_v52, %v582_v3  ;;  %605 = vst.msk [vmem:[%s278_s5 + $0x38] sm:$0xff] %vm597_vm8, %v595_v2 }
  0xdc   : > { %601 = vst.msk [vmem:[%s278_s5 + $0x18] sm:$0xff] %vm597_vm8, %v583_v4 }
  0xdd   : > { %925 = shalt.err (!%p922_p12)
}
  0xde   : > { %s995_s8 = smov 128   ;;  %s996_s23 = smov 8  }
  0xdf   : > { %795 = dma.vmem_to_hbm [thread:$0]  (%p1074_p9), %s623_s21, 1024, %s625_s18, %s607_s15, %s995_s8, %s995_s8, %s996_s23  }
  0xe0 PF: > { %s639_s25 = sand.u32 1, %s964_s12   ;;  %p802_p13 = pnand %p745_p3, %p1081_p11 }
  0xe1   : > { %s640_s5 = scalar_lea.sflag [#allocation4], %s639_s25 }
  0xe2   : > { %p803_p0 = pneg %p802_p13 }
  0xe4   : > { %959 = dma.done.wait (%p803_p0), %s640_s5, 1024  }
  0xe5   : > { %961 = vsyncadd (%p803_p0), %s640_s5, 4294966272  ;;  %s20_s17 = sadd.s32 1, %s984_s17   ;;  %s1327_s12 = smov %s968_s13 }
  0xe6   : > { %p17_p1 = scmp.ge.s32.totalorder %s20_s17, 4   ;;  %s1328_s13 = smov %s972_s14 }
  0xe7   : > { %s1329_s14 = smov %s1079_s27  ;;  %s1330_s15 = smov %s980_s16 }
  0xe8   : > { %s1331_s16 = smov %s1333_s20  ;;  %19 = sbr.rel (!%p17_p1) target bundleno = 7 (0x7), region = 90 }
  0xed   :  { %646 = vsyncpa [#allocation3], 1 }
  0xee   :  { %648 = vsyncpa [#allocation3 + $0x1], 1 }
  0xef   :  { %649 = vsyncpa [#allocation6], 1 }
  0xf0   :  { %650 = vsyncpa [#allocation4], 1 }
  0xf1   :  { %652 = vsyncpa [#allocation4 + $0x1], 1 }

</bundles_post_ra>
